<compile_context>
chip_gen: v6e
topology: v6e:2x2x1
jax: 0.10.0
libtpu: 0.0.40
codegen_flags: <defaults>
</compile_context>

<pallas_src>
import jax
import jax.numpy as jnp
from jax.experimental import pallas as pl
from jax.experimental.pallas import tpu as pltpu

_LANES = 128
_SMALL_N_FASTPATH = 65536  # below this, a single fused XLA op beats a custom call


def _linreg_kernel(w_ref, b_ref, x_ref, o_ref):
    # w_ref, b_ref: (1,) f32 scalars in SMEM.
    # x_ref, o_ref: (block_rows, 128) lane-dense tiles in VMEM.
    w = w_ref[0]
    b = b_ref[0]
    xv = x_ref[...].astype(jnp.float32)            # compute in f32 on the VPU
    o_ref[...] = (xv * w + b).astype(o_ref.dtype)


def _round_up(a, b):
    return ((a + b - 1) // b) * b


def _sublanes_for(dtype):
    # Native TPU tile height: 8 rows for 32-bit, 16 for 16-bit, 32 for 8-bit.
    return max(8, 32 // jnp.dtype(dtype).itemsize)


def _default_tile_rows():
    try:
        kind = jax.devices()[0].device_kind.lower()
    except Exception:
        kind = ""
    if "7" in kind:   # v7x: ~3.2 TB/s HBM -> bigger tiles amortize per-step overhead
        return 8192
    return 4096       # v5e / v6e: 2 MiB f32 tiles, 8 MiB double-buffered in+out


def _affine_xla(x, w_f32, b_f32):
    return (x.astype(jnp.float32) * w_f32 + b_f32).astype(x.dtype)


def linear_regression_forward(x, weight, bias, *, tile_rows=None, force_pallas=False):
    """y = x @ W^T + b for nn.Linear(1, 1).

    x: (N, 1) (or any (..., 1)), weight: (1, 1), bias: (1,).
    Returns the same shape/dtype as x.
    """
    orig_shape = x.shape
    out_dtype = x.dtype
    n = x.size

    w = weight.reshape(-1)[0].astype(jnp.float32)
    b = bias.reshape(-1)[0].astype(jnp.float32)

    # Small-N fast path: launch overhead dominates; let XLA fuse the affine.
    if n == 0 or (not force_pallas and n < _SMALL_N_FASTPATH):
        return _affine_xla(x, w, b)

    x_flat = x.reshape(-1)

    # 128-aligned prefix -> Pallas (free reshape, no pad); <128-element tail -> XLA.
    rows = n // _LANES
    n_main = rows * _LANES
    tail = n - n_main
    if rows == 0:
        return _affine_xla(x, w, b)

    sublanes = _sublanes_for(out_dtype)
    if tile_rows is None:
        tile_rows = _default_tile_rows()
    tile_rows = _round_up(max(int(tile_rows), sublanes), sublanes)

    # Keep >=2 grid steps when the data allows it (v7x has 2 TensorCores), but
    # never shrink below one native sublane tile.
    max_block = _round_up(pl.cdiv(rows, 2), sublanes)
    block_rows = max(sublanes, min(tile_rows, max_block))
    if rows <= block_rows:
        block_rows = rows        # single block == full array dims (always legal)
    grid = (pl.cdiv(rows, block_rows),)

    itemsize = jnp.dtype(out_dtype).itemsize
    tile_bytes = block_rows * _LANES * itemsize
    # Double-buffered input + output (~4x tile) plus slack; raise but never
    # exceed 48 MiB (fits v7x's 64 MiB physical VMEM, harmless on v5e/v6e).
    vmem_limit = int(min(48 << 20, max(32 << 20, 4 * tile_bytes + (2 << 20))))

    x_main = x_flat[:n_main].reshape(rows, _LANES)   # identity slice when tail == 0

    w_smem = w.reshape(1)
    b_smem = b.reshape(1)

    out_main = pl.pallas_call(
        _linreg_kernel,
        out_shape=jax.ShapeDtypeStruct((rows, _LANES), out_dtype),
        grid=grid,
        in_specs=[
            pl.BlockSpec(memory_space=pltpu.SMEM),                 # weight scalar
            pl.BlockSpec(memory_space=pltpu.SMEM),                 # bias scalar
            pl.BlockSpec((block_rows, _LANES), lambda i: (i, 0)),  # x tile
        ],
        out_specs=pl.BlockSpec((block_rows, _LANES), lambda i: (i, 0)),
        compiler_params=pltpu.CompilerParams(
            dimension_semantics=("parallel",),
            vmem_limit_bytes=vmem_limit),
    )(w_smem, b_smem, x_main)

    out_flat = out_main.reshape(-1)
    if tail:
        out_tail = _affine_xla(x_flat[n_main:], w, b)
        out_flat = jnp.concatenate([out_flat, out_tail])
    return out_flat.reshape(orig_shape)


if __name__ == "__main__":
    key = jax.random.PRNGKey(0)
    kx1, kx2, kx3, kw, kb = jax.random.split(key, 5)

    # Deterministic "parameters" matching nn.Linear(1, 1) shapes.
    weight = jax.random.uniform(kw, (1, 1), jnp.float32, minval=-1.0, maxval=1.0)
    bias = jax.random.uniform(kb, (1,), jnp.float32, minval=-1.0, maxval=1.0)

    # Tiny batch like the module demo -> small-N XLA fast path.
    x_tiny = jax.random.normal(kx1, (8, 1), jnp.float32)
    # Ragged batch -> 128-aligned prefix through Pallas + XLA tail.
    x_ragged = jax.random.normal(kx2, (300, 1), jnp.float32)
    # 128-multiple batch -> pure Pallas path (free reshape, no pad/slice).
    x_aligned = jax.random.normal(kx3, (1024, 1), jnp.float32)

    y_tiny = jax.block_until_ready(linear_regression_forward(x_tiny, weight, bias))
    y_ragged = jax.block_until_ready(
        linear_regression_forward(x_ragged, weight, bias, force_pallas=True))
    y_aligned = jax.block_until_ready(
        linear_regression_forward(x_aligned, weight, bias, force_pallas=True))

    # Reference check against plain JAX (same math as torch's linear layer).
    ref = lambda xx: xx @ weight.T + bias

    assert y_tiny.shape == (8, 1) and y_tiny.dtype == jnp.float32
    assert y_ragged.shape == (300, 1) and y_ragged.dtype == jnp.float32
    assert y_aligned.shape == (1024, 1) and y_aligned.dtype == jnp.float32
    assert jnp.allclose(y_tiny, ref(x_tiny), atol=1e-6), "mismatch (N=8, fast path)"
    assert jnp.allclose(y_ragged, ref(x_ragged), atol=1e-6), "mismatch (N=300, ragged)"
    assert jnp.allclose(y_aligned, ref(x_aligned), atol=1e-6), "mismatch (N=1024)"

    print("KERNEL_OK")
</pallas_src>

<mosaic_0001>
module attributes {stable_mosaic.version = 11 : i64} {
  func.func @_linreg_kernel(%arg0: i32, %arg1: memref<1xf32, #tpu.memory_space<smem>>, %arg2: memref<1xf32, #tpu.memory_space<smem>>, %arg3: memref<2x128xf32, #tpu.memory_space<vmem>>, %arg4: memref<2x128xf32, #tpu.memory_space<vmem>>) attributes {dimension_semantics = [#tpu.dimension_semantics<parallel>], iteration_bounds = array<i64: 1>, scalar_prefetch = 0 : i64, scratch_operands = 0 : i64, tpu.core_type = #tpu.core_type<tc>, window_params = [{transform_indices = @transform_0, window_bounds = array<i64: 1>}, {transform_indices = @transform_1, window_bounds = array<i64: 1>}, {transform_indices = @transform_2, window_bounds = array<i64: 2, 128>}, {transform_indices = @transform_3, window_bounds = array<i64: 2, 128>}]} {
    %c0 = arith.constant 0 : index
    %0 = memref.load %arg1[%c0] : memref<1xf32, #tpu.memory_space<smem>>
    %c0_0 = arith.constant 0 : index
    %1 = memref.load %arg2[%c0_0] : memref<1xf32, #tpu.memory_space<smem>>
    %c0_1 = arith.constant 0 : index
    %c0_2 = arith.constant 0 : index
    %2 = vector.load %arg3[%c0_1, %c0_2] : memref<2x128xf32, #tpu.memory_space<vmem>>, vector<2x128xf32>
    %3 = vector.broadcast %0 : f32 to vector<2x128xf32>
    %4 = arith.mulf %2, %3 : vector<2x128xf32>
    %5 = vector.broadcast %1 : f32 to vector<2x128xf32>
    %6 = arith.addf %4, %5 : vector<2x128xf32>
    %c0_3 = arith.constant 0 : index
    %c0_4 = arith.constant 0 : index
    %7 = vector.load %arg4[%c0_3, %c0_4] : memref<2x128xf32, #tpu.memory_space<vmem>>, vector<2x128xf32>
    tpu.vector_store %arg4[%c0_3, %c0_4], %6 {strides = array<i32>} : memref<2x128xf32, #tpu.memory_space<vmem>>, vector<2x128xf32>,
    return
  }
  func.func @transform_0(%arg0: i32) -> i32 {
    %c0_i32 = arith.constant 0 : i32
    %c0_i32_0 = arith.constant 0 : i32
    return %c0_i32 : i32
  }
  func.func @transform_1(%arg0: i32) -> i32 {
    %c0_i32 = arith.constant 0 : i32
    %c0_i32_0 = arith.constant 0 : i32
    return %c0_i32 : i32
  }
  func.func @transform_2(%arg0: i32) -> (i32, i32) {
    %c0_i32 = arith.constant 0 : i32
    %c0_i32_0 = arith.constant 0 : i32
    return %arg0, %c0_i32 : i32, i32
  }
  func.func @transform_3(%arg0: i32) -> (i32, i32) {
    %c0_i32 = arith.constant 0 : i32
    %c0_i32_0 = arith.constant 0 : i32
    return %arg0, %c0_i32 : i32, i32
  }
}

</mosaic_0001>

<bundles_post_ra>
// kernel: tpu_custom_call.1
= control target key start
LH: loop header
LB: loop body
LE: loop exit
PB: predicated region body
PF: predicated region fallthrough
CT: control target
= control target key end

     0   :  { %s95_s0 = inlined_call_operand.<no memory space> [shape: f32[1], index: 0, kind: input, shape index: {}]   ;;  %s96_s1 = inlined_call_operand.<no memory space> [shape: f32[1], index: 1, kind: input, shape index: {}]   ;;  %s97_s2 = inlined_call_operand.vmem [shape: f32[2,128], index: 2, kind: input, shape index: {}]   ;;  %s98_s3 = inlined_call_operand.hbm [shape: f32[2,128], index: 3, kind: output, shape index: {}]  }
   0x1   :  { %v19_v0 = vld [vmem:[%s97_s2] sm:$0x3]  ;;  %v20_v1 = vstv %s95_s0  ;;  %v22_v2 = vstv %s96_s1 }
   0x2   :  { %10 = vsyncpa [#allocation5], 0  ;;  %v21_v3 = vmul.f32 %v20_v1, %v19_v0  ;;  %s62_s18 = smov [#allocation4]  }
   0x3   :  { %s31_s19 = sshll.u32 %s62_s18, 4  ;;  %s32_s19 = int_to_ptr.vmem [resolvable:$true] %s31_s19 }
   0x4   :  { %v23_v4 = vadd.f32 %v22_v2, %v21_v3  ;;  %s40_s20 = scalar_lea.vmem %s32_s19, 32  ;;  %p45_p1 = scmp.lt.s32.totalorder %s32_s19, %s32_s19 }
   0x5   :  { %p41_p0 = scmp.ne.s32.totalorder %s32_s19, %s40_s20  ;;  %p46_p2 = scmp.lt.s32.totalorder %s40_s20, %s40_s20 }
   0x6   :  { %24 = vst [vmem:[#allocation4] sm:$0x3] %v23_v4 }
   0x7   :  { %p47_p3 = por %p46_p2, %p45_p1 }
   0x9   :  { %p48_p4 = pnand %p47_p3, %p41_p0 }
   0xb   :  { %51 = shalt.err (!%p48_p4)
}
   0xc   :  { %34 = dma.vmem_to_hbm [thread:$0]  %s32_s19, 32, %s98_s3, [#allocation5]  }
   0xd   :  { %60 = dma.done.wait [#allocation5], 32  }
   0xe   :  { %61 = vsyncadd [#allocation5], 4294967264 }
   0xf   :  { %38 = vsyncpa [#allocation5], 1 }

</bundles_post_ra>
